<compile_context>
chip_gen: v5e
topology: v5e:2x2
jax: 0.10.0
libtpu: 0.0.40
codegen_flags: <defaults>
</compile_context>

<pallas_src>
import jax
import jax.numpy as jnp
from jax.experimental import pallas as pl
from jax.experimental.pallas import tpu as pltpu

LANE = 128


def _round_up(v, m):
    return ((v + m - 1) // m) * m


def mlp_kernel(xT_ref, w0_ref, b0_ref, w1_ref, b1_ref, w2_ref, b2_ref, o_ref):
    x = xT_ref[...]                                                    # (20, TB)

    # dense0 + relu                      W0: [H, 20], b0: [H, 1]
    h = jnp.dot(w0_ref[...], x, preferred_element_type=jnp.float32) + b0_ref[...]
    h = jnp.maximum(h, 0.0)                                            # (H, TB)

    # dropout(p=0.5): identity in eval/inference mode.
    # TODO(synk): training-mode stochastic dropout (pltpu.prng_random_bits) not wired in.

    # dense1 + relu                      W1: [10, H], b1: [10, 1]
    h = jnp.dot(w1_ref[...], h, preferred_element_type=jnp.float32) + b1_ref[...]
    h = jnp.maximum(h, 0.0)                                            # (10, TB)

    # output                             W2: [2, 10], b2: [2, 1]
    logits = jnp.dot(w2_ref[...], h, preferred_element_type=jnp.float32) + b2_ref[...]  # (2, TB)

    # softmax over the 2 classes == [sigmoid(z0 - z1), 1 - sigmoid(z0 - z1)]
    # (exact identity; one EUP op, no cross-lane reductions, no constants).
    d = logits[0:1, :] - logits[1:2, :]                                # (1, TB)
    p0 = jax.nn.sigmoid(d)                                             # (1, TB)
    o_ref[0:1, :] = p0
    o_ref[1:2, :] = 1.0 - p0


def _choose_tile(B, tb_request):
    """Pick a lane-multiple batch tile; keep >=2 grid steps when B allows (v7x)."""
    b_rounded = _round_up(B, LANE)
    tb = min(tb_request, b_rounded)
    if b_rounded >= 2 * LANE:
        # Cap at half the (rounded) batch so a megacore part gets >= 2 steps.
        tb = min(tb, _round_up(pl.cdiv(b_rounded, 2), LANE))
    tb = max(LANE, (tb // LANE) * LANE)
    b_pad = pl.cdiv(B, tb) * tb
    return tb, b_pad


def _vmem_limit_bytes(F, H, tb, in_itemsize):
    pad8 = lambda n: _round_up(n, 8)
    x_bufs = 2 * pad8(F) * tb * in_itemsize                 # double-buffered X tile
    out_bufs = 2 * pad8(2) * tb * 4                         # double-buffered probs tile
    acts = (pad8(H) + pad8(10) + pad8(2) + 2 * pad8(1)) * tb * 4
    weights = 2 * 6 * 16 * 128 * 4                          # 6 tiny padded operands, 2 bufs
    est = x_bufs + out_bufs + acts + weights
    # 2x headroom + 2 MiB slop; well under v7x's 64 MiB physical VMEM.
    return min(60 * 1024 * 1024, 2 * est + (2 << 20))


def skorch_forward(x, params, *, tb=8192, use_bf16=False):
    """x: [B, 20] float32 (PyTorch layout). Returns softmax probs [B, 2]."""
    w0, b0, w1, b1, w2, b2 = params
    B, F = x.shape
    assert F == w0.shape[1]
    H = w0.shape[0]

    tb, b_pad = _choose_tile(B, tb)
    grid = (b_pad // tb,)

    stream_dtype = jnp.bfloat16 if use_bf16 else jnp.float32
    # Batch-on-lanes layout [F, b_pad]; pad+transpose is one fused XLA op and
    # zero-padded columns are harmless (sliced off below).
    xT = jnp.pad(x, ((0, b_pad - B), (0, 0))).T.astype(stream_dtype)
    w0s, w1s, w2s = (w.astype(stream_dtype) for w in (w0, w1, w2))

    # Weights/biases: full-array blocks, grid-invariant -> stay VMEM-resident.
    full = lambda a: pl.BlockSpec(a.shape, lambda i: (0, 0))

    n_weight_elems = (w0.size + b0.size + w1.size + b1.size + w2.size + b2.size)
    cost = pl.CostEstimate(
        flops=2 * b_pad * (w0.size + w1.size + w2.size),
        transcendentals=b_pad,
        bytes_accessed=(xT.dtype.itemsize * xT.size
                        + 4 * 2 * b_pad
                        + stream_dtype.dtype.itemsize * (w0.size + w1.size + w2.size)
                        + 4 * (b0.size + b1.size + b2.size)),
    )

    outT = pl.pallas_call(
        mlp_kernel,
        out_shape=jax.ShapeDtypeStruct((2, b_pad), jnp.float32),
        grid=grid,
        in_specs=[
            pl.BlockSpec((F, tb), lambda i: (0, i)),   # X tile (double-buffered)
            full(w0s), full(b0), full(w1s), full(b1), full(w2s), full(b2),
        ],
        out_specs=pl.BlockSpec((2, tb), lambda i: (0, i)),
        compiler_params=pltpu.CompilerParams(
            dimension_semantics=("parallel",),          # megacore sharding on v7x
            vmem_limit_bytes=_vmem_limit_bytes(F, H, tb, xT.dtype.itemsize),
        ),
        cost_estimate=cost,
    )(xT, w0s, b0, w1s, b1, w2s, b2)

    return outT[:, :B].T                                # back to [B, 2]


def init_params(key, num_units=10):
    # Deterministic init mimicking nn.Linear's U(-1/sqrt(fan_in), 1/sqrt(fan_in)).
    # Weights kept in PyTorch's [out, in] layout; biases as [out, 1] columns.
    def linear(key, fan_in, fan_out):
        kw, kb = jax.random.split(key)
        bound = 1.0 / jnp.sqrt(float(fan_in))
        w = jax.random.uniform(kw, (fan_out, fan_in), jnp.float32, -bound, bound)
        b = jax.random.uniform(kb, (fan_out, 1), jnp.float32, -bound, bound)
        return w, b

    k0, k1, k2 = jax.random.split(key, 3)
    w0, b0 = linear(k0, 20, num_units)      # dense0: Linear(20, num_units)
    w1, b1 = linear(k1, num_units, 10)      # dense1: Linear(num_units, 10)
    w2, b2 = linear(k2, 10, 2)              # output: Linear(10, 2)
    return (w0, b0, w1, b1, w2, b2)


def _reference(x, params):
    w0, b0, w1, b1, w2, b2 = params
    h = jnp.maximum(x @ w0.T + b0.T, 0.0)
    h = jnp.maximum(h @ w1.T + b1.T, 0.0)
    logits = h @ w2.T + b2.T
    return jax.nn.softmax(logits, axis=1)


if __name__ == "__main__":
    key = jax.random.PRNGKey(0)
    kx, kp = jax.random.split(key)
    B = 8
    x = jax.random.normal(kx, (B, 20), dtype=jnp.float32)
    params = init_params(kp, num_units=10)

    out = skorch_forward(x, params)
    out = jax.block_until_ready(out)

    ref = _reference(x, params)
    assert out.shape == (B, 2)
    assert jnp.allclose(jnp.sum(out, axis=1), 1.0, atol=1e-5)
    assert jnp.allclose(out, ref, atol=1e-5, rtol=1e-5)
    print("KERNEL_OK")
</pallas_src>

<mosaic_0001>
module attributes {stable_mosaic.version = 11 : i64} {
  func.func @mlp_kernel(%arg0: i32, %arg1: memref<20x128xf32, #tpu.memory_space<vmem>>, %arg2: memref<10x20xf32, #tpu.memory_space<vmem>>, %arg3: memref<10x1xf32, #tpu.memory_space<vmem>>, %arg4: memref<10x10xf32, #tpu.memory_space<vmem>>, %arg5: memref<10x1xf32, #tpu.memory_space<vmem>>, %arg6: memref<2x10xf32, #tpu.memory_space<vmem>>, %arg7: memref<2x1xf32, #tpu.memory_space<vmem>>, %arg8: memref<2x128xf32, #tpu.memory_space<vmem>>) attributes {dimension_semantics = [#tpu.dimension_semantics<parallel>], iteration_bounds = array<i64: 1>, scalar_prefetch = 0 : i64, scratch_operands = 0 : i64, tpu.core_type = #tpu.core_type<tc>, window_params = [{transform_indices = @transform_0, window_bounds = array<i64: 20, 128>}, {pipeline_mode = #tpu.pipeline_mode<synchronous>, transform_indices = @transform_1, window_bounds = array<i64: 10, 20>}, {pipeline_mode = #tpu.pipeline_mode<synchronous>, transform_indices = @transform_2, window_bounds = array<i64: 10, 1>}, {pipeline_mode = #tpu.pipeline_mode<synchronous>, transform_indices = @transform_3, window_bounds = array<i64: 10, 10>}, {pipeline_mode = #tpu.pipeline_mode<synchronous>, transform_indices = @transform_4, window_bounds = array<i64: 10, 1>}, {pipeline_mode = #tpu.pipeline_mode<synchronous>, transform_indices = @transform_5, window_bounds = array<i64: 2, 10>}, {pipeline_mode = #tpu.pipeline_mode<synchronous>, transform_indices = @transform_6, window_bounds = array<i64: 2, 1>}, {transform_indices = @transform_7, window_bounds = array<i64: 2, 128>}]} {
    %c0 = arith.constant 0 : index
    %c0_0 = arith.constant 0 : index
    %0 = vector.load %arg1[%c0, %c0_0] : memref<20x128xf32, #tpu.memory_space<vmem>>, vector<20x128xf32>
    %c0_1 = arith.constant 0 : index
    %c0_2 = arith.constant 0 : index
    %1 = vector.load %arg2[%c0_1, %c0_2] : memref<10x20xf32, #tpu.memory_space<vmem>>, vector<10x20xf32>
    %cst = arith.constant dense<0.000000e+00> : vector<10x128xf32>
    %2 = tpu.matmul %1, %0, %cst {dimension_numbers = #tpu.dot_dimension_numbers<[1], [0], [0], [1], [0, 0, 1, 1], [], []>} : vector<10x20xf32>, vector<20x128xf32>, vector<10x128xf32> -> vector<10x128xf32>
    %c0_3 = arith.constant 0 : index
    %c0_4 = arith.constant 0 : index
    %3 = vector.load %arg3[%c0_3, %c0_4] : memref<10x1xf32, #tpu.memory_space<vmem>>, vector<10x1xf32>
    %4 = vector.broadcast %3 : vector<10x1xf32> to vector<10x128xf32>
    %5 = arith.addf %2, %4 : vector<10x128xf32>
    %cst_5 = arith.constant 0.000000e+00 : f32
    %6 = vector.broadcast %cst_5 : f32 to vector<10x128xf32>
    %7 = arith.maximumf %5, %6 : vector<10x128xf32>
    %c0_6 = arith.constant 0 : index
    %c0_7 = arith.constant 0 : index
    %8 = vector.load %arg4[%c0_6, %c0_7] : memref<10x10xf32, #tpu.memory_space<vmem>>, vector<10x10xf32>
    %cst_8 = arith.constant dense<0.000000e+00> : vector<10x128xf32>
    %9 = tpu.matmul %8, %7, %cst_8 {dimension_numbers = #tpu.dot_dimension_numbers<[1], [0], [0], [1], [0, 0, 1, 1], [], []>} : vector<10x10xf32>, vector<10x128xf32>, vector<10x128xf32> -> vector<10x128xf32>
    %c0_9 = arith.constant 0 : index
    %c0_10 = arith.constant 0 : index
    %10 = vector.load %arg5[%c0_9, %c0_10] : memref<10x1xf32, #tpu.memory_space<vmem>>, vector<10x1xf32>
    %11 = vector.broadcast %10 : vector<10x1xf32> to vector<10x128xf32>
    %12 = arith.addf %9, %11 : vector<10x128xf32>
    %cst_11 = arith.constant 0.000000e+00 : f32
    %13 = vector.broadcast %cst_11 : f32 to vector<10x128xf32>
    %14 = arith.maximumf %12, %13 : vector<10x128xf32>
    %c0_12 = arith.constant 0 : index
    %c0_13 = arith.constant 0 : index
    %15 = vector.load %arg6[%c0_12, %c0_13] : memref<2x10xf32, #tpu.memory_space<vmem>>, vector<2x10xf32>
    %cst_14 = arith.constant dense<0.000000e+00> : vector<2x128xf32>
    %16 = tpu.matmul %15, %14, %cst_14 {dimension_numbers = #tpu.dot_dimension_numbers<[1], [0], [0], [1], [0, 0, 1, 1], [], []>} : vector<2x10xf32>, vector<10x128xf32>, vector<2x128xf32> -> vector<2x128xf32>
    %c0_15 = arith.constant 0 : index
    %c0_16 = arith.constant 0 : index
    %17 = vector.load %arg7[%c0_15, %c0_16] : memref<2x1xf32, #tpu.memory_space<vmem>>, vector<2x1xf32>
    %18 = vector.broadcast %17 : vector<2x1xf32> to vector<2x128xf32>
    %19 = arith.addf %16, %18 : vector<2x128xf32>
    %20 = vector.extract_strided_slice %19 {offsets = [0, 0], sizes = [1, 128], strides = [1, 1]} : vector<2x128xf32> to vector<1x128xf32>
    %21 = vector.extract_strided_slice %19 {offsets = [1, 0], sizes = [1, 128], strides = [1, 1]} : vector<2x128xf32> to vector<1x128xf32>
    %22 = arith.subf %20, %21 : vector<1x128xf32>
    %23 = arith.negf %22 : vector<1x128xf32>
    %24 = math.exp %23 : vector<1x128xf32>
    %cst_17 = arith.constant 1.000000e+00 : f32
    %25 = vector.broadcast %cst_17 : f32 to vector<1x128xf32>
    %26 = arith.addf %25, %24 : vector<1x128xf32>
    %27 = arith.divf %25, %26 : vector<1x128xf32>
    %c0_18 = arith.constant 0 : index
    %c0_19 = arith.constant 0 : index
    %28 = vector.load %arg8[%c0_18, %c0_19] : memref<2x128xf32, #tpu.memory_space<vmem>>, vector<1x128xf32>
    tpu.vector_store %arg8[%c0_18, %c0_19], %27 {strides = array<i32>} : memref<2x128xf32, #tpu.memory_space<vmem>>, vector<1x128xf32>,
    %cst_20 = arith.constant 1.000000e+00 : f32
    %29 = vector.broadcast %cst_20 : f32 to vector<1x128xf32>
    %30 = arith.subf %29, %27 : vector<1x128xf32>
    %c1 = arith.constant 1 : index
    %c0_21 = arith.constant 0 : index
    %31 = vector.load %arg8[%c1, %c0_21] : memref<2x128xf32, #tpu.memory_space<vmem>>, vector<1x128xf32>
    tpu.vector_store %arg8[%c1, %c0_21], %30 {strides = array<i32>} : memref<2x128xf32, #tpu.memory_space<vmem>>, vector<1x128xf32>,
    return
  }
  func.func @transform_0(%arg0: i32) -> (i32, i32) {
    %c0_i32 = arith.constant 0 : i32
    %c0_i32_0 = arith.constant 0 : i32
    return %c0_i32, %arg0 : i32, i32
  }
  func.func @transform_1(%arg0: i32) -> (i32, i32) {
    %c0_i32 = arith.constant 0 : i32
    %c0_i32_0 = arith.constant 0 : i32
    %c0_i32_1 = arith.constant 0 : i32
    return %c0_i32, %c0_i32_0 : i32, i32
  }
  func.func @transform_2(%arg0: i32) -> (i32, i32) {
    %c0_i32 = arith.constant 0 : i32
    %c0_i32_0 = arith.constant 0 : i32
    %c0_i32_1 = arith.constant 0 : i32
    return %c0_i32, %c0_i32_0 : i32, i32
  }
  func.func @transform_3(%arg0: i32) -> (i32, i32) {
    %c0_i32 = arith.constant 0 : i32
    %c0_i32_0 = arith.constant 0 : i32
    %c0_i32_1 = arith.constant 0 : i32
    return %c0_i32, %c0_i32_0 : i32, i32
  }
  func.func @transform_4(%arg0: i32) -> (i32, i32) {
    %c0_i32 = arith.constant 0 : i32
    %c0_i32_0 = arith.constant 0 : i32
    %c0_i32_1 = arith.constant 0 : i32
    return %c0_i32, %c0_i32_0 : i32, i32
  }
  func.func @transform_5(%arg0: i32) -> (i32, i32) {
    %c0_i32 = arith.constant 0 : i32
    %c0_i32_0 = arith.constant 0 : i32
    %c0_i32_1 = arith.constant 0 : i32
    return %c0_i32, %c0_i32_0 : i32, i32
  }
  func.func @transform_6(%arg0: i32) -> (i32, i32) {
    %c0_i32 = arith.constant 0 : i32
    %c0_i32_0 = arith.constant 0 : i32
    %c0_i32_1 = arith.constant 0 : i32
    return %c0_i32, %c0_i32_0 : i32, i32
  }
  func.func @transform_7(%arg0: i32) -> (i32, i32) {
    %c0_i32 = arith.constant 0 : i32
    %c0_i32_0 = arith.constant 0 : i32
    return %c0_i32, %arg0 : i32, i32
  }
}

</mosaic_0001>

<bundles_post_ra>
// kernel: tpu_custom_call.1
= control target key start
LH: loop header
LB: loop body
LE: loop exit
PB: predicated region body
PF: predicated region fallthrough
CT: control target
= control target key end

     0   :  { %12 = vsyncpa [#allocation3], 0  ;;  %s429_s0 = inlined_call_operand.vmem [shape: f32[20,128], index: 0, kind: input, shape index: {}]   ;;  %s430_s1 = inlined_call_operand.hbm [shape: f32[10,20], index: 1, kind: input, shape index: {}]   ;;  %s431_s2 = inlined_call_operand.vmem [shape: f32[10,1], index: 2, kind: input, shape index: {}]   ;;  %s432_s3 = inlined_call_operand.hbm [shape: f32[10,10], index: 3, kind: input, shape index: {}]   ;;  %s433_s4 = inlined_call_operand.vmem [shape: f32[10,1], index: 4, kind: input, shape index: {}]   ;;  %s434_s5 = inlined_call_operand.vmem [shape: f32[2,10], index: 5, kind: input, shape index: {}]   ;;  %s435_s6 = inlined_call_operand.vmem [shape: f32[2,1], index: 6, kind: input, shape index: {}]   ;;  %s436_s7 = inlined_call_operand.hbm [shape: f32[2,128], index: 7, kind: output, shape index: {}]  }
   0x1   :  { %13 = vsyncpa [#allocation6], 0 }
   0x2   :  { %14 = vsyncpa [#allocation4], 0  ;;  %s21_s26 = sshll.u32 %s430_s1, 4  ;;  %s342_s27 = smov [#allocation2]   ;;  %s22_s26 = int_to_ptr.hbm [resolvable:$true] %s21_s26 }
   0x3   :  { %s23_s28 = sshll.u32 %s342_s27, 4  ;;  %s36_s8 = sshll.u32 %s432_s3, 4  ;;  %s24_s28 = int_to_ptr.vmem [resolvable:$true] %s23_s28  ;;  %s37_s8 = int_to_ptr.hbm [resolvable:$true] %s36_s8 }
   0x4   :  { %s343_s9 = smov 128   ;;  %s344_s10 = smov 8  }
   0x5   :  { %29 = dma.hbm_to_vmem [thread:$0]  %s22_s26, 256, %s24_s28, [#allocation3], %s343_s9, %s343_s9, %s344_s10  }
   0x6   :  { %s345_s11 = smov [#allocation5]  }
   0x7   :  { %s38_s12 = sshll.u32 %s345_s11, 4  ;;  %s39_s12 = int_to_ptr.vmem [resolvable:$true] %s38_s12 }
   0x8   :  { %44 = dma.hbm_to_vmem [thread:$0]  %s37_s8, 256, %s39_s12, [#allocation6], %s343_s9, %s343_s9, %s344_s10  }
   0x9   :  { %336 = dma.done.wait [#allocation3], 256  }
   0xa   :  { %337 = vsyncadd [#allocation3], 4294967040 }
   0xb   :  { %338 = dma.done.wait [#allocation6], 256  }
   0xc   :  { %339 = vsyncadd [#allocation6], 4294967040  ;;  %v346_v0 = vmov 0   ;;  %vm83_vm0 = vcmask 1043456   ;;  %v61_v1 = vld [vmem:[%s429_s0 + $0x10] sm:$0xf] }
   0xd   :  { %257 = vset.pattern.permute.xlu0 %v346_v0  ;;  %258 = vset.pattern.permute.xlu1 %v346_v0  ;;  %v60_v2 = vld [vmem:[%s429_s0 + $0x8] sm:$0xff]  ;;  %v59_v4 = vld [vmem:[%s429_s0] sm:$0xff]  ;;  %vm76_vm1 = vcmask 162816   ;;  %vm133_vm2 = vcmask 1041408   ;;  %v112_v18 = vld [vmem:[#allocation5] sm:$0xff]  ;;  %vm126_vm3 = vcmask 80896  }
   0xe   :  { %259 = vset.pattern.permute.xlu2 %v346_v0  ;;  %239 = vmatpush.msk.msra.mxu0 %vm83_vm0, %v61_v1  ;;  %v65_v3 = vld [vmem:[%s431_s2 + $0x8] sm:$0x3]  ;;  %v62_v5 = vld [vmem:[#allocation2] sm:$0xff]  ;;  %v113_v19 = vld [vmem:[#allocation5 + $0x8] sm:$0x3]  ;;  %s228_s28 = sshll.u32 %s436_s7, 4  ;;  %s229_s28 = int_to_ptr.hbm [resolvable:$true] %s228_s28 }
   0xf   :  { %248 = vmatpush.msk.msra.mxu3 %vm83_vm0, %v61_v1  ;;  %73 = vperm.xlu0 %257, %v65_v3   ;;  %v63_v6 = vld [vmem:[#allocation2 + $0x8] sm:$0x3]  ;;  %v64_v7 = vld [vmem:[%s431_s2] sm:$0xff] }
  0x10   :  { %101 = vmatpush.msra.mxu0 %v60_v2  ;;  %v115_v8 = vld [vmem:[%s433_s4 + $0x8] sm:$0x3]  ;;  %v114_v9 = vld [vmem:[%s433_s4] sm:$0xff] }
  0x11   :  { %249 = vmatpush.msra.mxu3 %v60_v2  ;;  %123 = vperm.xlu1 %258, %v115_v8   ;;  %v163_v20 = vld [vmem:[%s435_s6] sm:$0x3] }
  0x12   :  { %102 = vmatpush.msra.mxu0 %v59_v4  ;;  %166 = vperm.xlu2 %259, %v163_v20   ;;  %v162_v29 = vld [vmem:[%s434_s5] sm:$0x3]  ;;  %s347_s5 = smov [#allocation7]  }
  0x13   :  { %250 = vmatpush.msra.mxu3 %v59_v4  ;;  %240 = vmatmul.msk.f32.vlgmr.msra.gmra.mxu0 %vm76_vm1, %v62_v5  ;;  %s226_s6 = sshll.u32 %s347_s5, 4  ;;  %s227_s6 = int_to_ptr.vmem [resolvable:$true] %s226_s6 }
  0x14   :  { %241 = vmatmul.msk.f32.vlgmr.msra.gmra.mxu3 %vm76_vm1, %v63_v6 }
  0x17   :  { %68 = vperm.xlu0 %257, %v64_v7  }
  0x19   :  { %118 = vperm.xlu1 %258, %v114_v9  }
  0x6c   :  { %v167_v30 = vpop.permute.xlu2 %166 }
  0x81   :  { %v74_v10 = vpop.permute.xlu0 %73 }
  0x83   :  { %v124_v21 = vpop.permute.xlu1 %123 }
  0x89   :  { %v69_v11 = vpop.permute.xlu0 %68 }
  0x8b   :  { %v119_v23 = vpop.permute.xlu1 %118 }
  0x90   :  { %v104_v12 = vpop.f32.mrf.mxu0 }
  0x91   :  { %v105_v14 = vadd.f32 %v104_v12, %v69_v11 }
  0x93   :  { %v110_v17 = vmax.f32 %v105_v14, 0.0 }
  0x97   :  { %v107_v13 = vpop.f32.mrf.mxu3 }
  0x98   :  { %v108_v15 = vadd.f32 %v107_v13, %v74_v10 }
  0x9a   :  { %v111_v16 = vmax.f32 %v108_v15, 0.0 }
  0x9c   :  { %242 = vmatpush.msk.msra.mxu1 %vm133_vm2, %v111_v16 }
  0x9e   :  { %152 = vmatpush.msra.mxu1 %v110_v17 }
  0x9f   :  { %243 = vmatmul.msk.f32.vlgmr.msra.gmra.mxu1 %vm126_vm3, %v112_v18 }
  0xa7   :  { %244 = vmatmul.msk.f32.gmra.mxu1 %vm126_vm3, %v113_v19 }
 0x11c   :  { %v154_v22 = vpop.f32.mrf.mxu1 }
 0x11d   :  { %v155_v25 = vadd.f32 %v154_v22, %v119_v23 }
 0x11f   :  { %v160_v28 = vmax.f32 %v155_v25, 0.0 }
 0x124   :  { %v157_v24 = vpop.f32.mrf.mxu1 }
 0x125   :  { %v158_v26 = vadd.f32 %v157_v24, %v124_v21 }
 0x127   :  { %v161_v27 = vmax.f32 %v158_v26, 0.0 }
 0x129   :  { %245 = vmatpush.msk.msra.mxu2 %vm133_vm2, %v161_v27 }
 0x12b   :  { %190 = vmatpush.msra.mxu2 %v160_v28 }
 0x12c   :  { %246 = vmatmul.msk.f32.vlgmr.msra.gmra.mxu2 %vm126_vm3, %v162_v29 }
 0x1af   :  { %v192_v31 = vpop.f32.mrf.mxu2 }
 0x1b0   :  { %v193_v32 = vadd.f32 %v192_v31, %v167_v30 }
 0x1b2   :  { %v196_v33 = vrot.slane %v193_v32, 1 }
 0x1b4   :  { %v198_v34 = vsub.f32 %v193_v32, %v196_v33 }
 0x1b6   :  { %v247_v35 = vmul.f32 -1.442695, %v198_v34 }
 0x1b8   :  { %260 = vpow2.f32 %v247_v35 }
 0x1be   :  { %v261_v36 = vpop.eup %260 }
 0x1bf   :  { %v202_v37 = vadd.f32 1.0, %v261_v36 }
 0x1c1   :  { %262 = vrcp.f32 %v202_v37  ;;  %v214_v41 = vand.u32 2147483648, %v202_v37  ;;  %v212_v43 = vand.u32 2147483647, %v202_v37  ;;  %vm208_vm5 = vweird.f32 %v202_v37 }
 0x1c3   :  { %v215_v45 = vor.u32 1.1754944e-38, %v214_v41  ;;  %vm213_vm7 = vcmp.eq.f32.partialorder %v212_v43, 8.507059e+37 }
 0x1c7   :  { %v263_v38 = vpop.eup %262 }
 0x1c8   :  { %v204_v39 = vmul.f32 %v263_v38, %v202_v37  ;;  %vm209_vm4 = vweird.f32 %v263_v38 }
 0x1c9   :  { %vm210_vm6 = vmor %vm208_vm5, %vm209_vm4 }
 0x1ca   :  { %v205_v40 = vsub.f32 1.0, %v204_v39 }
 0x1cc   :  { %v206_v42 = vmul.f32 %v263_v38, %v205_v40 }
 0x1ce   :  { %v207_v44 = vadd.f32 %v263_v38, %v206_v42 }
 0x1d0   :  { %v211_v46 = vsel %vm210_vm6, %v263_v38, %v207_v44 }
 0x1d1   :  { %v216_v47 = vsel %vm213_vm7, %v215_v45, %v211_v46 }
 0x1d2   :  { %218 = vst [vmem:[#allocation7] sm:$0x1] %v216_v47  ;;  %v219_v48 = vsub.f32 1.0, %v216_v47 }
 0x1d4   :  { %220 = vst [vmem:[#allocation7 + $0x1] sm:$0x1] %v219_v48 }
 0x1d5   :  { %231 = dma.vmem_to_hbm [thread:$0]  %s227_s6, 32, %s229_s28, [#allocation4]  }
 0x1d6   :  { %340 = dma.done.wait [#allocation4], 32  }
 0x1d7   :  { %341 = vsyncadd [#allocation4], 4294967264 }
 0x1d8   :  { %236 = vsyncpa [#allocation3], 1 }
 0x1d9   :  { %237 = vsyncpa [#allocation6], 1 }
 0x1da   :  { %238 = vsyncpa [#allocation4], 1 }

</bundles_post_ra>
